<compile_context>
chip_gen: v7x
topology: tpu7x:2x2x1
jax: 0.10.0
libtpu: 0.0.40
codegen_flags: <defaults>
</compile_context>

<pallas_src>
import functools

import jax
import jax.numpy as jnp
from jax.experimental import pallas as pl
from jax.experimental.pallas import tpu as pltpu


def _projection_kernel(x_ref, w2_ref, b2_ref, w1_ref, w3_ref, b13_ref, code_ref):
    """One (image, spatial-tile): code = W1 x + W3 SiLU(W2 x + b2) + (b1 + b3)."""
    x = x_ref[0]                                               # (C, ts), input dtype

    # Hidden 1x1 conv (channels-first: out = W @ x), f32 accumulate, SiLU (EUP).
    h = jnp.dot(w2_ref[...], x, preferred_element_type=jnp.float32)
    h = h + b2_ref[...]                                        # (C, ts), f32
    h = h * jax.nn.sigmoid(h)                                  # SiLU, kept in f32

    # Linear + nonlinear clusterers: two small dots, shared pre-summed bias.
    code = jnp.dot(w1_ref[...], x, preferred_element_type=jnp.float32)
    code = code + jnp.dot(w3_ref[...].astype(jnp.float32), h,
                          preferred_element_type=jnp.float32)
    code = code + b13_ref[...]                                 # (dim, ts), f32

    code_ref[0] = code.astype(code_ref.dtype)


def _choose_spatial_tile(S, tile_s):
    """Largest tile <= tile_s that divides S (prefers multiples of 128).

    Returns (ts, needs_pad). needs_pad is True only for pathological S with no
    usable divisor (e.g. a large prime), in which case ts is lane-aligned and
    the wrapper falls back to pad + slice.
    """
    if S <= tile_s:
        return S, False
    t = (tile_s // 128) * 128
    while t >= 128:
        if S % t == 0:
            return t, False
        t -= 128
    # No lane-aligned divisor; accept any reasonably large divisor.
    for d in range(min(tile_s, S), 511, -1):
        if S % d == 0:
            return d, False
    # TODO(synk): pathological S (e.g. prime) -> pad + slice fallback.
    return max((tile_s // 128) * 128, 128), True


@functools.partial(jax.jit, static_argnames=("tile_s",))
def projection_forward(feat_nchw, params, tile_s=8192):
    """feat_nchw: (N, C, H, W). Returns (feat, code) with code (N, dim, H, W)."""
    N, C, H, W = feat_nchw.shape
    dtype = feat_nchw.dtype
    dim = params["w1"].shape[0]
    S = H * W

    # Cast weights to the activation dtype (native bf16 MXU path, less DMA);
    # keep biases in f32 -- they are added to the f32 accumulators.
    w1 = params["w1"].astype(dtype)                       # (dim, C)
    w2 = params["w2"].astype(dtype)                       # (C, C)
    w3 = params["w3"].astype(dtype)                       # (dim, C)
    b2c = params["b2"].astype(jnp.float32).reshape(C, 1)  # (C, 1)
    b13 = (params["b1"].astype(jnp.float32)
           + params["b3"].astype(jnp.float32)).reshape(dim, 1)

    # Channels-first view: (N, C, S). Contiguous reshape -- no transpose pass.
    x = feat_nchw.reshape(N, C, S)

    # Small-spatial regime: fold the batch onto lanes so the output block is
    # lane-dense and the per-step overhead is amortized over the whole batch.
    fold_batch = (S < 128) and (N > 1)
    if fold_batch:
        xk = x.transpose(1, 0, 2).reshape(1, C, N * S)     # (1, C, N*S)
        Nk, Sk = 1, N * S
    else:
        xk = x
        Nk, Sk = N, S

    # Spatial tile that divides Sk exactly (no pad / no output slice).
    ts, needs_pad = _choose_spatial_tile(Sk, tile_s)
    s_pad = Sk
    if needs_pad:
        s_pad = pl.cdiv(Sk, ts) * ts
        xk = jnp.pad(xk, ((0, 0), (0, 0), (0, s_pad - Sk)))

    # Grid: (images, spatial tiles). Both axes independent -> megacore-sharded
    # on v7x. For very large tile_s keep the grid >= 2 steps there.
    grid = (Nk, s_pad // ts)
    code = pl.pallas_call(
        _projection_kernel,
        out_shape=jax.ShapeDtypeStruct((Nk, dim, s_pad), dtype),
        grid_spec=pltpu.PrefetchScalarGridSpec(
            num_scalar_prefetch=0,
            grid=grid,
            in_specs=[
                pl.BlockSpec((1, C, ts), lambda n, j: (n, 0, j)),    # x tile
                pl.BlockSpec((C, C), lambda n, j: (0, 0)),           # W2
                pl.BlockSpec((C, 1), lambda n, j: (0, 0)),           # b2
                pl.BlockSpec((dim, C), lambda n, j: (0, 0)),         # W1
                pl.BlockSpec((dim, C), lambda n, j: (0, 0)),         # W3
                pl.BlockSpec((dim, 1), lambda n, j: (0, 0)),         # b1+b3
            ],
            out_specs=pl.BlockSpec((1, dim, ts), lambda n, j: (n, 0, j)),
        ),
        compiler_params=pltpu.CompilerParams(
            dimension_semantics=("parallel", "parallel")),
    )(xk, w2, b2c, w1, w3, b13)

    if needs_pad:
        code = code[:, :, :Sk]
    if fold_batch:
        code = code.reshape(dim, N, S).transpose(1, 0, 2)    # (N, dim, S)
    code = code.reshape(N, dim, H, W)

    # NetWithActivations-style hooks: tapped activations are the input feature
    # map (Dropout2d is identity in eval) and the projected code.
    return feat_nchw, code


def init_params(key, n_feats, dim, dtype=jnp.float32):
    """Deterministic init. 1x1 conv weights stored channels-out-first (out, in)."""
    k1, k2, k3, k4, k5, k6 = jax.random.split(key, 6)

    def conv_init(kw, kb, cin, cout):
        # PyTorch Conv2d default: kaiming-uniform-ish bound = 1/sqrt(fan_in).
        bound = float(cin) ** -0.5
        w = jax.random.uniform(kw, (cout, cin), dtype, -bound, bound)
        b = jax.random.uniform(kb, (cout,), dtype, -bound, bound)
        return w, b

    w1, b1 = conv_init(k1, k2, n_feats, dim)      # cluster1
    w2, b2 = conv_init(k3, k4, n_feats, n_feats)  # cluster2 layer 0
    w3, b3 = conv_init(k5, k6, n_feats, dim)      # cluster2 layer 2
    return {"w1": w1, "b1": b1, "w2": w2, "b2": b2, "w3": w3, "b3": b3}


def reference_forward(feat, params):
    """Pure-JAX reference of the same eval-mode math, for a sanity check."""
    N, C, H, W = feat.shape
    x = feat.reshape(N, C, H * W).astype(jnp.float32)
    lin = jnp.einsum("oc,ncs->nos", params["w1"], x) + params["b1"][None, :, None]
    h = jnp.einsum("oc,ncs->nos", params["w2"], x) + params["b2"][None, :, None]
    h = h * jax.nn.sigmoid(h)
    nl = jnp.einsum("oc,ncs->nos", params["w3"], h) + params["b3"][None, :, None]
    code = (lin + nl).astype(feat.dtype)
    dim = params["w1"].shape[0]
    return code.reshape(N, dim, H, W)


if __name__ == "__main__":
    key = jax.random.PRNGKey(0)
    k_feat, k_feat2, k_params = jax.random.split(key, 3)

    # Small shapes consistent with the module: N=2, n_feats=32, dim=16.
    N, n_feats, dim = 2, 32, 16
    params = init_params(k_params, n_feats, dim)

    # Case 1: tiny spatial extent (8x8) -> batch-folded lane-dense path.
    H1, W1 = 8, 8
    feat1 = jax.random.normal(k_feat, (N, n_feats, H1, W1), dtype=jnp.float32)
    out_feat1, code1 = projection_forward(feat1, params)
    jax.block_until_ready((out_feat1, code1))
    ref1 = reference_forward(feat1, params)
    assert out_feat1.shape == (N, n_feats, H1, W1)
    assert code1.shape == (N, dim, H1, W1)
    assert jnp.allclose(out_feat1, feat1)
    assert jnp.allclose(code1, ref1, atol=1e-5, rtol=1e-5)

    # Case 2: per-image spatial-tile path (16x16, S=256 >= 128).
    H2, W2 = 16, 16
    feat2 = jax.random.normal(k_feat2, (N, n_feats, H2, W2), dtype=jnp.float32)
    out_feat2, code2 = projection_forward(feat2, params)
    jax.block_until_ready((out_feat2, code2))
    ref2 = reference_forward(feat2, params)
    assert code2.shape == (N, dim, H2, W2)
    assert jnp.allclose(out_feat2, feat2)
    assert jnp.allclose(code2, ref2, atol=1e-5, rtol=1e-5)

    print("KERNEL_OK")
</pallas_src>

<mosaic_0001>
module attributes {stable_mosaic.version = 11 : i64} {
  func.func @_projection_kernel(%arg0: i32, %arg1: i32, %arg2: memref<1x32x128xf32, #tpu.memory_space<vmem>>, %arg3: memref<32x32xf32, #tpu.memory_space<vmem>>, %arg4: memref<32x1xf32, #tpu.memory_space<vmem>>, %arg5: memref<16x32xf32, #tpu.memory_space<vmem>>, %arg6: memref<16x32xf32, #tpu.memory_space<vmem>>, %arg7: memref<16x1xf32, #tpu.memory_space<vmem>>, %arg8: memref<1x16x128xf32, #tpu.memory_space<vmem>>) attributes {dimension_semantics = [#tpu.dimension_semantics<parallel>, #tpu.dimension_semantics<parallel>], iteration_bounds = array<i64: 1, 1>, scalar_prefetch = 0 : i64, scratch_operands = 0 : i64, tpu.core_type = #tpu.core_type<tc>, window_params = [{transform_indices = @transform_0, window_bounds = array<i64: 1, 32, 128>}, {pipeline_mode = #tpu.pipeline_mode<synchronous>, transform_indices = @transform_1, window_bounds = array<i64: 32, 32>}, {pipeline_mode = #tpu.pipeline_mode<synchronous>, transform_indices = @transform_2, window_bounds = array<i64: 32, 1>}, {pipeline_mode = #tpu.pipeline_mode<synchronous>, transform_indices = @transform_3, window_bounds = array<i64: 16, 32>}, {pipeline_mode = #tpu.pipeline_mode<synchronous>, transform_indices = @transform_4, window_bounds = array<i64: 16, 32>}, {pipeline_mode = #tpu.pipeline_mode<synchronous>, transform_indices = @transform_5, window_bounds = array<i64: 16, 1>}, {transform_indices = @transform_6, window_bounds = array<i64: 1, 16, 128>}]} {
    %c0 = arith.constant 0 : index
    %c0_0 = arith.constant 0 : index
    %c0_1 = arith.constant 0 : index
    %0 = vector.load %arg2[%c0, %c0_0, %c0_1] : memref<1x32x128xf32, #tpu.memory_space<vmem>>, vector<1x32x128xf32>
    %1 = vector.shape_cast %0 : vector<1x32x128xf32> to vector<32x128xf32>
    %c0_2 = arith.constant 0 : index
    %c0_3 = arith.constant 0 : index
    %2 = vector.load %arg3[%c0_2, %c0_3] : memref<32x32xf32, #tpu.memory_space<vmem>>, vector<32x32xf32>
    %cst = arith.constant dense<0.000000e+00> : vector<32x128xf32>
    %3 = tpu.matmul %2, %1, %cst {dimension_numbers = #tpu.dot_dimension_numbers<[1], [0], [0], [1], [0, 0, 1, 1], [], []>} : vector<32x32xf32>, vector<32x128xf32>, vector<32x128xf32> -> vector<32x128xf32>
    %c0_4 = arith.constant 0 : index
    %c0_5 = arith.constant 0 : index
    %4 = vector.load %arg4[%c0_4, %c0_5] : memref<32x1xf32, #tpu.memory_space<vmem>>, vector<32x1xf32>
    %5 = vector.broadcast %4 : vector<32x1xf32> to vector<32x128xf32>
    %6 = arith.addf %3, %5 : vector<32x128xf32>
    %7 = arith.negf %6 : vector<32x128xf32>
    %8 = math.exp %7 : vector<32x128xf32>
    %cst_6 = arith.constant 1.000000e+00 : f32
    %9 = vector.broadcast %cst_6 : f32 to vector<32x128xf32>
    %10 = arith.addf %9, %8 : vector<32x128xf32>
    %11 = arith.divf %9, %10 : vector<32x128xf32>
    %12 = arith.mulf %6, %11 : vector<32x128xf32>
    %c0_7 = arith.constant 0 : index
    %c0_8 = arith.constant 0 : index
    %13 = vector.load %arg5[%c0_7, %c0_8] : memref<16x32xf32, #tpu.memory_space<vmem>>, vector<16x32xf32>
    %cst_9 = arith.constant dense<0.000000e+00> : vector<16x128xf32>
    %14 = tpu.matmul %13, %1, %cst_9 {dimension_numbers = #tpu.dot_dimension_numbers<[1], [0], [0], [1], [0, 0, 1, 1], [], []>} : vector<16x32xf32>, vector<32x128xf32>, vector<16x128xf32> -> vector<16x128xf32>
    %c0_10 = arith.constant 0 : index
    %c0_11 = arith.constant 0 : index
    %15 = vector.load %arg6[%c0_10, %c0_11] : memref<16x32xf32, #tpu.memory_space<vmem>>, vector<16x32xf32>
    %cst_12 = arith.constant dense<0.000000e+00> : vector<16x128xf32>
    %16 = tpu.matmul %15, %12, %cst_12 {dimension_numbers = #tpu.dot_dimension_numbers<[1], [0], [0], [1], [0, 0, 1, 1], [], []>} : vector<16x32xf32>, vector<32x128xf32>, vector<16x128xf32> -> vector<16x128xf32>
    %17 = arith.addf %14, %16 : vector<16x128xf32>
    %c0_13 = arith.constant 0 : index
    %c0_14 = arith.constant 0 : index
    %18 = vector.load %arg7[%c0_13, %c0_14] : memref<16x1xf32, #tpu.memory_space<vmem>>, vector<16x1xf32>
    %19 = vector.broadcast %18 : vector<16x1xf32> to vector<16x128xf32>
    %20 = arith.addf %17, %19 : vector<16x128xf32>
    %c0_15 = arith.constant 0 : index
    %c0_16 = arith.constant 0 : index
    %c0_17 = arith.constant 0 : index
    %21 = vector.load %arg8[%c0_15, %c0_16, %c0_17] : memref<1x16x128xf32, #tpu.memory_space<vmem>>, vector<1x16x128xf32>
    %22 = vector.shape_cast %21 : vector<1x16x128xf32> to vector<16x128xf32>
    %23 = vector.shape_cast %20 : vector<16x128xf32> to vector<1x16x128xf32>
    tpu.vector_store %arg8[%c0_15, %c0_16, %c0_17], %23 {strides = array<i32>} : memref<1x16x128xf32, #tpu.memory_space<vmem>>, vector<1x16x128xf32>,
    return
  }
  func.func @transform_0(%arg0: i32, %arg1: i32) -> (i32, i32, i32) {
    %c0_i32 = arith.constant 0 : i32
    %c0_i32_0 = arith.constant 0 : i32
    return %arg0, %c0_i32, %arg1 : i32, i32, i32
  }
  func.func @transform_1(%arg0: i32, %arg1: i32) -> (i32, i32) {
    %c0_i32 = arith.constant 0 : i32
    %c0_i32_0 = arith.constant 0 : i32
    %c0_i32_1 = arith.constant 0 : i32
    return %c0_i32, %c0_i32_0 : i32, i32
  }
  func.func @transform_2(%arg0: i32, %arg1: i32) -> (i32, i32) {
    %c0_i32 = arith.constant 0 : i32
    %c0_i32_0 = arith.constant 0 : i32
    %c0_i32_1 = arith.constant 0 : i32
    return %c0_i32, %c0_i32_0 : i32, i32
  }
  func.func @transform_3(%arg0: i32, %arg1: i32) -> (i32, i32) {
    %c0_i32 = arith.constant 0 : i32
    %c0_i32_0 = arith.constant 0 : i32
    %c0_i32_1 = arith.constant 0 : i32
    return %c0_i32, %c0_i32_0 : i32, i32
  }
  func.func @transform_4(%arg0: i32, %arg1: i32) -> (i32, i32) {
    %c0_i32 = arith.constant 0 : i32
    %c0_i32_0 = arith.constant 0 : i32
    %c0_i32_1 = arith.constant 0 : i32
    return %c0_i32, %c0_i32_0 : i32, i32
  }
  func.func @transform_5(%arg0: i32, %arg1: i32) -> (i32, i32) {
    %c0_i32 = arith.constant 0 : i32
    %c0_i32_0 = arith.constant 0 : i32
    %c0_i32_1 = arith.constant 0 : i32
    return %c0_i32, %c0_i32_0 : i32, i32
  }
  func.func @transform_6(%arg0: i32, %arg1: i32) -> (i32, i32, i32) {
    %c0_i32 = arith.constant 0 : i32
    %c0_i32_0 = arith.constant 0 : i32
    return %arg0, %c0_i32, %arg1 : i32, i32, i32
  }
}

</mosaic_0001>

<bundles_post_ra>
// kernel: projection_forward.1
= control target key start
LH: loop header
LB: loop body
LE: loop exit
PB: predicated region body
PF: predicated region fallthrough
CT: control target
= control target key end

     0   :  { %vm55_vm0 = vcmask 261120   ;;  %v480_v3 = vmov 0   ;;  %s596_s0 = inlined_call_operand.vmem [shape: f32[1,32,128], index: 0, kind: input, shape index: {}]   ;;  %s597_s1 = inlined_call_operand.vmem [shape: f32[32,32], index: 1, kind: input, shape index: {}]   ;;  %s598_s2 = inlined_call_operand.vmem [shape: f32[32,1], index: 2, kind: input, shape index: {}]   ;;  %s599_s5 = inlined_call_operand.vmem [shape: f32[16,1], index: 5, kind: input, shape index: {}]   ;;  %s600_s4 = inlined_call_operand.vmem [shape: f32[16,32], index: 4, kind: input, shape index: {}]   ;;  %s601_s3 = inlined_call_operand.vmem [shape: f32[16,32], index: 3, kind: input, shape index: {}]   ;;  %s602_s6 = inlined_call_operand.vmem [shape: f32[1,16,128], index: 6, kind: output, shape index: {}]  }
   0x1   :  { %v23_v0 = vld [vmem:[%s596_s0] sm:$0xff]  ;;  %v24_v1 = vld [vmem:[%s596_s0 + $0x8] sm:$0xff]  ;;  %v25_v2 = vld [vmem:[%s596_s0 + $0x10] sm:$0xff]  ;;  %462 = vset.pattern.permute.xlu0 %v480_v3  ;;  %463 = vset.pattern.permute.xlu1 %v480_v3 }
   0x2   :  { %v525_v4 = vpack.c.bf16 %v24_v1, %v23_v0  ;;  %v26_v5 = vld [vmem:[%s596_s0 + $0x18] sm:$0xff]  ;;  %v27_v6 = vld [vmem:[%s597_s1] sm:$0xff]  ;;  %v33_v9 = vld [vmem:[%s598_s2 + $0x10] sm:$0xff] }
   0x3   :  { %v533_v7 = vpack.c.bf16 %v26_v5, %v25_v2  ;;  %407 = vmatprep.mubr.msk.f32.mxu0 %vm55_vm0, %v27_v6  ;;  %v31_v8 = vld [vmem:[%s598_s2] sm:$0xff]  ;;  %47 = vperm.xlu1 %463, %v33_v9   ;;  %v32_v10 = vld [vmem:[%s598_s2 + $0x8] sm:$0xff]  ;;  %v34_v11 = vld [vmem:[%s598_s2 + $0x18] sm:$0xff] }
   0x4   :  { %436 = vmatprep.subr.bf16.mxu0 %v525_v4  ;;  %37 = vperm.xlu0 %462, %v31_v8   ;;  %v28_v12 = vld [vmem:[%s597_s1 + $0x8] sm:$0xff]  ;;  %v347_v13 = vld [vmem:[%s599_s5] sm:$0xff]  ;;  %v29_v14 = vld [vmem:[%s597_s1 + $0x10] sm:$0xff] }
   0x5   :  { %438 = vmatpush3.bf16.msra.mxu0 %v525_v4  ;;  %v348_v15 = vld [vmem:[%s599_s5 + $0x8] sm:$0xff]  ;;  %v30_v16 = vld [vmem:[%s597_s1 + $0x18] sm:$0xff]  ;;  %v183_v17 = vld [vmem:[%s600_s4] sm:$0xff] }
   0x6   :  { %440 = vmatprep.subr.bf16.mxu0 %v533_v7  ;;  %421 = vmatprep.mubr.msk.f32.mxu1 %vm55_vm0, %v183_v17  ;;  %v184_v52 = vld [vmem:[%s600_s4 + $0x8] sm:$0xff]  ;;  %v181_v53 = vld [vmem:[%s601_s3] sm:$0xff] }
   0x7   :  { %52 = vperm.xlu1 %463, %v34_v11   ;;  %v182_v54 = vld [vmem:[%s601_s3 + $0x8] sm:$0xff] }
   0x8   :  { %42 = vperm.xlu0 %462, %v32_v10  }
   0x9   :  { %442 = vmatpush3.bf16.msra.mxu0 %v533_v7 }
   0xb   :  { %356 = vperm.xlu1 %463, %v348_v15  }
   0xc   :  { %408 = vmatmul.mubr.msk.f32.vlgmr.msra.gmra.mrb[0].mxu0 %vm55_vm0, %v28_v12  ;;  %351 = vperm.xlu0 %462, %v347_v13  }
   0xd   :  { %410 = vmatprep.mubr.msk.f32.mxu0 %vm55_vm0, %v29_v14 }
  0x10   :  { %411 = vmatmul.mubr.msk.f32.gmra.mrb[2].mxu0 %vm55_vm0, %v30_v16 }
  0x82   :  { %v48_v19 = vpop.permute.xlu1 %47 }
  0x83   :  { %v38_v18 = vpop.permute.xlu0 %37 }
  0x86   :  { %v53_v26 = vpop.permute.xlu1 %52 }
  0x87   :  { %v43_v20 = vpop.permute.xlu0 %42 }
  0x8a   :  { %v357_v55 = vpop.permute.xlu1 %356 }
  0x8b   :  { %v352_v57 = vpop.permute.xlu0 %351 }
  0xdf   :  { %v409_v21 = vpop.f32.mrb[0].mxu0 }
  0xe0   :  { %v140_v22 = vadd.f32 %v409_v21, %v43_v20  ;;  %v134_v23 = vpop.f32.mrb[1].mxu0 }
  0xe1   :  { %v135_v24 = vadd.f32 %v134_v23, %v38_v18 }
  0xe2   :  { %v372_v25 = vmul.f32 -1.442695, %v140_v22 }
  0xe3   :  { %v371_v27 = vmul.f32 -1.442695, %v135_v24  ;;  %v412_v28 = vpop.f32.mrb[2].mxu0 }
  0xe4   :  { %464 = vpow2.f32 %v372_v25  ;;  %v150_v29 = vadd.f32 %v412_v28, %v53_v26  ;;  %v144_v30 = vpop.f32.mrb[3].mxu0 }
  0xe5   :  { %466 = vpow2.f32 %v371_v27  ;;  %v145_v31 = vadd.f32 %v144_v30, %v48_v19 }
  0xe6   :  { %v374_v32 = vmul.f32 -1.442695, %v150_v29 }
  0xe7   :  { %v373_v33 = vmul.f32 -1.442695, %v145_v31 }
  0xe8   :  { %468 = vpow2.f32 %v374_v32 }
  0xe9   :  { %470 = vpow2.f32 %v373_v33 }
  0xee   :  { %v465_v34 = vpop.eup %464 }
  0xef   :  { %v467_v35 = vpop.eup %466  ;;  %v166_v36 = vadd.f32 1.0, %v465_v34 }
  0xf0   :  { %v165_v37 = vadd.f32 1.0, %v467_v35 }
  0xf1   :  { %472 = vrcp.f32 %v166_v36 }
  0xf2   :  { %v469_v38 = vpop.eup %468  ;;  %474 = vrcp.f32 %v165_v37 }
  0xf3   :  { %v471_v39 = vpop.eup %470  ;;  %v168_v40 = vadd.f32 1.0, %v469_v38 }
  0xf4   :  { %v167_v41 = vadd.f32 1.0, %v471_v39 }
  0xf5   :  { %476 = vrcp.f32 %v168_v40 }
  0xf6   :  { %478 = vrcp.f32 %v167_v41 }
  0xfb   :  { %v473_v42 = vpop.eup %472 }
  0xfc   :  { %v475_v43 = vpop.eup %474  ;;  %v178_v44 = vmul.f32 %v473_v42, %v140_v22 }
  0xfd   :  { %v177_v45 = vmul.f32 %v475_v43, %v135_v24 }
  0xff   :  { %v477_v46 = vpop.eup %476  ;;  %v443_v47 = vpack.c.bf16 %v178_v44, %v177_v45 }
 0x100   :  { %v479_v48 = vpop.eup %478  ;;  %v180_v49 = vmul.f32 %v477_v46, %v150_v29 }
 0x101   :  { %v179_v50 = vmul.f32 %v479_v48, %v145_v31  ;;  %444 = vmatprep.subr.bf16.mxu1 %v443_v47 }
 0x102   :  { %446 = vmatpush3.bf16.msra.mxu1 %v443_v47 }
 0x103   :  { %v447_v51 = vpack.c.bf16 %v180_v49, %v179_v50 }
 0x105   :  { %448 = vmatprep.subr.bf16.mxu1 %v447_v51 }
 0x106   :  { %450 = vmatpush3.bf16.msra.mxu1 %v447_v51 }
 0x107   :  { %452 = vmatprep.subr.bf16.mxu1 %v525_v4 }
 0x109   :  { %422 = vmatmul.mubr.msk.f32.vlgmr.msra.gmra.mrb[0].mxu1 %vm55_vm0, %v184_v52 }
 0x10a   :  { %454 = vmatpush3.bf16.msra.mxu1 %v525_v4  ;;  %432 = vmatprep.mubr.msk.f32.mxu1 %vm55_vm0, %v181_v53 }
 0x10b   :  { %456 = vmatprep.subr.bf16.mxu1 %v533_v7 }
 0x10e   :  { %458 = vmatpush3.bf16.msra.mxu1 %v533_v7 }
 0x111   :  { %433 = vmatmul.mubr.msk.f32.vlgmr.msra.gmra.mrb[0].mxu1 %vm55_vm0, %v182_v54 }
 0x1e4   :  { %v434_v56 = vpop.f32.mrb[0].mxu1 }
 0x1e5   :  { %v360_v58 = vadd.f32 %v434_v56, %v357_v55  ;;  %v338_v59 = vpop.f32.mrb[1].mxu1 }
 0x1e6   :  { %v359_v60 = vadd.f32 %v352_v57, %v338_v59 }
 0x1e7   :  { %362 = vst [vmem:[%s602_s6 + $0x8] sm:$0xff] %v360_v58 }
 0x1e8   :  { %361 = vst [vmem:[%s602_s6] sm:$0xff] %v359_v60 }

</bundles_post_ra>
